<compile_context>
chip_gen: v6e
topology: v6e:2x2x1
jax: 0.10.0
libtpu: 0.0.40
codegen_flags: <defaults>
</compile_context>

<pallas_src>
import functools

import numpy as np
import jax
import jax.numpy as jnp
from jax.experimental import pallas as pl
from jax.experimental.pallas import tpu as pltpu


_VMEM_LIMIT_BYTES = 32 * 1024 * 1024   # explicit scoped-VMEM limit, fits every gen
_VMEM_BUDGET_FRAC = 0.6                # headroom for compiler temporaries
_LANE, _SUBLANE = 128, 8


def _round_up(v, m):
    return -(-v // m) * m


def _pool_kernel(x_ref, pw_ref, o_ref, *, s, w):
    """One grid block of the fused s x s average pool.

    x_ref : (mt, s*w) block; row m holds the s consecutive source image rows
            feeding output row m, concatenated along the lane dimension.
    pw_ref: (w, wf) bf16 constant; column j has 1/s on rows j*s .. j*s+s-1.
    o_ref : (mt, wf) output block, in the input dtype.
    """
    x = x_ref[...]
    # H-direction pooling: sum the s lane-contiguous W-wide chunks (VPU adds).
    acc = x[:, 0:w].astype(jnp.float32)
    for i in range(1, s):
        acc = acc + x[:, i * w:(i + 1) * w].astype(jnp.float32)
    # Fold one 1/s here (f32); the other 1/s lives in pw -> exact 1/s**2 total.
    lhs = (acc * (1.0 / s)).astype(jnp.bfloat16)
    # W-direction pooling on the MXU: (mt, w) @ (w, wf), f32 accumulate.
    y = jnp.dot(lhs, pw_ref[...], preferred_element_type=jnp.float32)
    o_ref[...] = y.astype(o_ref.dtype)


def _pick_row_tile(m_rows, s, w, wf, elem_bytes):
    """Rows of the (M, s*W) problem per grid step, sized to a VMEM budget
    (double-buffered in/out blocks + the small constant), and split so the
    'parallel' row axis has >=2 blocks on 2-TensorCore chips (v7x) whenever
    there is enough work to matter."""
    budget = int(_VMEM_LIMIT_BYTES * _VMEM_BUDGET_FRAC)
    pw_vmem = 2 * _round_up(w, _SUBLANE) * _round_up(wf, _LANE) * 2   # bf16, 2 bufs
    per_row = 2 * (_round_up(s * w, _LANE) + _round_up(wf, _LANE)) * elem_bytes
    cap = max(_SUBLANE, (budget - pw_vmem) // per_row)
    cap = max(_SUBLANE, (cap // _SUBLANE) * _SUBLANE)
    if m_rows <= cap:
        mt = m_rows
        # Enough data to be worth sharding across two TensorCores?
        if m_rows >= 2 * _SUBLANE and m_rows * s * w * elem_bytes > (2 << 20):
            mt = _round_up((m_rows + 1) // 2, _SUBLANE)
    else:
        mt = cap                    # multiple of 8; last block may be partial
    return mt


def input_projection_a_forward(x_nchw, *, sampling_times):
    """InputProjectionA.forward: `sampling_times` chained AvgPool2d(2, 2, 0)."""
    if sampling_times == 0:
        return x_nchw

    b, c, h, w = x_nchw.shape
    s = 2 ** sampling_times
    hf, wf = h // s, w // s          # chained floors == one floor by 2**k
    if hf < 1 or wf < 1:
        raise ValueError("input too small for the requested samplingTimes")

    dtype = x_nchw.dtype
    elem_bytes = jnp.dtype(dtype).itemsize

    # Drop trailing H rows that no pooled output reads (PyTorch floor
    # behaviour); no-op slice when h % s == 0.  Trailing W columns are dropped
    # by zero rows in the pooling matrix instead, so no copy is needed there.
    x = x_nchw[:, :, : hf * s, :]
    # Contiguous (free) reshape: one row per output pixel-row, holding its s
    # source image rows back-to-back along lanes.
    m_rows = b * c * hf
    x2 = x.reshape(m_rows, s * w)

    # Separable W-pooling matrix (w, wf): column j averages lanes j*s..j*s+s-1.
    # 1/s is exact in bf16 for power-of-two s.
    pw = jnp.asarray(
        (np.arange(w)[:, None] // s == np.arange(wf)[None, :]).astype(np.float32) / s,
        dtype=jnp.bfloat16)

    mt = _pick_row_tile(m_rows, s, w, wf, elem_bytes)
    grid = (pl.cdiv(m_rows, mt),)

    out = pl.pallas_call(
        functools.partial(_pool_kernel, s=s, w=w),
        out_shape=jax.ShapeDtypeStruct((m_rows, wf), dtype),
        grid_spec=pltpu.PrefetchScalarGridSpec(
            num_scalar_prefetch=0,
            grid=grid,
            in_specs=[
                pl.BlockSpec((mt, s * w), lambda i: (i, 0)),
                pl.BlockSpec((w, wf), lambda i: (0, 0)),   # revisited constant
            ],
            out_specs=pl.BlockSpec((mt, wf), lambda i: (i, 0)),
        ),
        compiler_params=pltpu.CompilerParams(
            dimension_semantics=("parallel",),
            vmem_limit_bytes=_VMEM_LIMIT_BYTES,
        ),
        cost_estimate=pl.CostEstimate(
            flops=2 * m_rows * w * wf + m_rows * (s - 1) * w,
            transcendentals=0,
            bytes_accessed=(m_rows * s * w + m_rows * wf) * elem_bytes + w * wf * 2,
        ),
    )(x2, pw)

    # Free reshape back to NCHW, already in the input dtype.
    return out.reshape(b, c, hf, wf)


if __name__ == "__main__":
    SAMPLING_TIMES = 2
    B, C, H, W = 2, 4, 16, 16

    x = jax.random.normal(jax.random.PRNGKey(0), (B, C, H, W), dtype=jnp.float32)

    fwd = jax.jit(functools.partial(input_projection_a_forward,
                                    sampling_times=SAMPLING_TIMES))
    y = fwd(x)
    jax.block_until_ready(y)

    # Plain-JAX reference: literally chain SAMPLING_TIMES 2x2 average pools.
    def ref_pool(v, times):
        r = v
        for _ in range(times):
            rb, rc, rh, rw = r.shape
            r = r[:, :, : 2 * (rh // 2), : 2 * (rw // 2)]
            r = r.reshape(rb, rc, rh // 2, 2, rw // 2, 2).mean(axis=(3, 5))
        return r

    ref = ref_pool(x, SAMPLING_TIMES)
    assert y.shape == ref.shape == (B, C, H // 4, W // 4), y.shape
    assert y.dtype == x.dtype
    assert bool(jnp.all(jnp.isfinite(y)))
    # bf16 MXU operands => allow bf16-level rounding; any layout / pooling bug
    # would give O(1) errors.
    max_err = float(jnp.max(jnp.abs(y - ref)))
    assert max_err < 2e-2, max_err

    # Output dtype follows input dtype (no extra converts): quick bf16 check.
    xb = x.astype(jnp.bfloat16)
    yb = jax.block_until_ready(fwd(xb))
    assert yb.dtype == jnp.bfloat16
    max_err_b = float(jnp.max(jnp.abs(
        yb.astype(jnp.float32) - ref_pool(xb.astype(jnp.float32), SAMPLING_TIMES))))
    assert max_err_b < 3e-2, max_err_b

    print("KERNEL_OK")
</pallas_src>

<mosaic_0001>
module attributes {stable_mosaic.version = 11 : i64} {
  func.func @_pool_kernel(%arg0: i32, %arg1: memref<32x64xf32, #tpu.memory_space<vmem>>, %arg2: memref<16x4xbf16, #tpu.memory_space<vmem>>, %arg3: memref<32x4xf32, #tpu.memory_space<vmem>>) attributes {dimension_semantics = [#tpu.dimension_semantics<parallel>], iteration_bounds = array<i64: 1>, scalar_prefetch = 0 : i64, scratch_operands = 0 : i64, tpu.core_type = #tpu.core_type<tc>, window_params = [{transform_indices = @transform_0, window_bounds = array<i64: 32, 64>}, {pipeline_mode = #tpu.pipeline_mode<synchronous>, transform_indices = @transform_1, window_bounds = array<i64: 16, 4>}, {transform_indices = @transform_2, window_bounds = array<i64: 32, 4>}]} {
    %c0 = arith.constant 0 : index
    %c0_0 = arith.constant 0 : index
    %0 = vector.load %arg1[%c0, %c0_0] : memref<32x64xf32, #tpu.memory_space<vmem>>, vector<32x64xf32>
    %1 = vector.extract_strided_slice %0 {offsets = [0, 0], sizes = [32, 16], strides = [1, 1]} : vector<32x64xf32> to vector<32x16xf32>
    %2 = vector.extract_strided_slice %0 {offsets = [0, 16], sizes = [32, 16], strides = [1, 1]} : vector<32x64xf32> to vector<32x16xf32>
    %3 = arith.addf %1, %2 : vector<32x16xf32>
    %4 = vector.extract_strided_slice %0 {offsets = [0, 32], sizes = [32, 16], strides = [1, 1]} : vector<32x64xf32> to vector<32x16xf32>
    %5 = arith.addf %3, %4 : vector<32x16xf32>
    %6 = vector.extract_strided_slice %0 {offsets = [0, 48], sizes = [32, 16], strides = [1, 1]} : vector<32x64xf32> to vector<32x16xf32>
    %7 = arith.addf %5, %6 : vector<32x16xf32>
    %cst = arith.constant 2.500000e-01 : f32
    %8 = vector.broadcast %cst : f32 to vector<32x16xf32>
    %9 = arith.mulf %7, %8 : vector<32x16xf32>
    %10 = arith.truncf %9 : vector<32x16xf32> to vector<32x16xbf16>
    %c0_1 = arith.constant 0 : index
    %c0_2 = arith.constant 0 : index
    %11 = vector.load %arg2[%c0_1, %c0_2] : memref<16x4xbf16, #tpu.memory_space<vmem>>, vector<16x4xbf16>
    %cst_3 = arith.constant dense<0.000000e+00> : vector<32x4xf32>
    %12 = tpu.matmul %10, %11, %cst_3 {dimension_numbers = #tpu.dot_dimension_numbers<[1], [0], [0], [1], [0, 0, 1, 1], [], []>} : vector<32x16xbf16>, vector<16x4xbf16>, vector<32x4xf32> -> vector<32x4xf32>
    %c0_4 = arith.constant 0 : index
    %c0_5 = arith.constant 0 : index
    %13 = vector.load %arg3[%c0_4, %c0_5] : memref<32x4xf32, #tpu.memory_space<vmem>>, vector<32x4xf32>
    tpu.vector_store %arg3[%c0_4, %c0_5], %12 {strides = array<i32>} : memref<32x4xf32, #tpu.memory_space<vmem>>, vector<32x4xf32>,
    return
  }
  func.func @transform_0(%arg0: i32) -> (i32, i32) {
    %c0_i32 = arith.constant 0 : i32
    %c0_i32_0 = arith.constant 0 : i32
    return %arg0, %c0_i32 : i32, i32
  }
  func.func @transform_1(%arg0: i32) -> (i32, i32) {
    %c0_i32 = arith.constant 0 : i32
    %c0_i32_0 = arith.constant 0 : i32
    %c0_i32_1 = arith.constant 0 : i32
    return %c0_i32, %c0_i32_0 : i32, i32
  }
  func.func @transform_2(%arg0: i32) -> (i32, i32) {
    %c0_i32 = arith.constant 0 : i32
    %c0_i32_0 = arith.constant 0 : i32
    return %arg0, %c0_i32 : i32, i32
  }
}

</mosaic_0001>

<bundles_post_ra>
// kernel: input_projection_a_forward.1
= control target key start
LH: loop header
LB: loop body
LE: loop exit
PB: predicated region body
PF: predicated region fallthrough
CT: control target
= control target key end

     0   :  { %s201_s13 = smov 112   ;;  %s240_s0 = inlined_call_operand.vmem [shape: f32[32,64], index: 0, kind: input, shape index: {}]   ;;  %s241_s1 = inlined_call_operand.vmem [shape: bf16[16,4], index: 1, kind: input, shape index: {}]   ;;  %s242_s2 = inlined_call_operand.hbm [shape: f32[32,4], index: 2, kind: output, shape index: {}]  }
   0x1   :  { %v15_v0 = vld [vmem:[%s240_s0 + $0x10] sm:$0xff]  ;;  %v13_v1 = vld [vmem:[%s240_s0] sm:$0xff]  ;;  %v16_v2 = vld [vmem:[%s240_s0 + $0x18] sm:$0xff] }
   0x2   :  { %25 = vrot.lane.b32.xlu1 %v15_v0, %s201_s13  ;;  %21 = vrot.lane.b32.xlu0 %v13_v1, %s201_s13  ;;  %v14_v3 = vld [vmem:[%s240_s0 + $0x8] sm:$0xff] }
   0x3   :  { %7 = vsyncpa [#allocation3], 0  ;;  %v178_v4 = vld [vmem:[%s241_s1] sm:$0xff]   ;;  %s202_s20 = smov 96   ;;  %s203_s21 = smov 80   ;;  %vm83_vm0 = vcmask 130048  }
   0x4   :  { %166 = vmatprep.subr.bf16.mxu0 %v178_v4  ;;  %vm139_vm1 = vcmask 31744   ;;  %s204_s0 = smov [#allocation2]  }
   0x5   :  { %167 = vmatpush3.bf16.msra.mxu0 %v178_v4  ;;  %s149_s1 = sshll.u32 %s204_s0, 4  ;;  %s150_s1 = int_to_ptr.vmem [resolvable:$true] %s149_s1 }
   0x6   :  { %27 = vrot.lane.b32.xlu1 %v16_v2, %s201_s13  ;;  %23 = vrot.lane.b32.xlu0 %v14_v3, %s201_s13  ;;  %s179_s22 = scalar_lea.vmem %s150_s1, 512  ;;  %p184_p1 = scmp.lt.s32.totalorder %s150_s1, %s150_s1 }
   0x7   :  { %p180_p0 = scmp.ne.s32.totalorder %s150_s1, %s179_s22  ;;  %p185_p2 = scmp.lt.s32.totalorder %s179_s22, %s179_s22 }
   0x9   :  { %p186_p3 = por %p185_p2, %p184_p1 }
   0xa   :  { %39 = vrot.lane.b32.xlu1 %v14_v3, %s202_s20  ;;  %37 = vrot.lane.b32.xlu0 %v13_v1, %s202_s20 }
   0xb   :  { %p187_p4 = pnand %p186_p3, %p180_p0 }
   0xe   :  { %43 = vrot.lane.b32.xlu1 %v16_v2, %s202_s20  ;;  %41 = vrot.lane.b32.xlu0 %v15_v0, %s202_s20 }
  0x12   :  { %55 = vrot.lane.b32.xlu1 %v14_v3, %s203_s21  ;;  %53 = vrot.lane.b32.xlu0 %v13_v1, %s203_s21 }
  0x16   :  { %59 = vrot.lane.b32.xlu1 %v16_v2, %s203_s21  ;;  %57 = vrot.lane.b32.xlu0 %v15_v0, %s203_s21 }
  0x74   :  { %v26_v5 = vpop.permute.xlu1 %25  ;;  %v22_v6 = vpop.permute.xlu0 %21 }
  0x75   :  { %v33_v13 = vadd.f32 %v22_v6, %v13_v1  ;;  %v35_v19 = vadd.f32 %v26_v5, %v15_v0 }
  0x78   :  { %v28_v7 = vpop.permute.xlu1 %27  ;;  %v24_v8 = vpop.permute.xlu0 %23 }
  0x79   :  { %v34_v14 = vadd.f32 %v24_v8, %v14_v3  ;;  %v36_v20 = vadd.f32 %v28_v7, %v16_v2 }
  0x7c   :  { %v40_v9 = vpop.permute.xlu1 %39  ;;  %v38_v10 = vpop.permute.xlu0 %37 }
  0x7d   :  { %v50_v15 = vadd.f32 %v40_v9, %v34_v14  ;;  %v49_v16 = vadd.f32 %v38_v10, %v33_v13 }
  0x80   :  { %v44_v11 = vpop.permute.xlu1 %43  ;;  %v42_v12 = vpop.permute.xlu0 %41 }
  0x81   :  { %v52_v23 = vadd.f32 %v44_v11, %v36_v20  ;;  %v51_v24 = vadd.f32 %v42_v12, %v35_v19 }
  0x84   :  { %v56_v17 = vpop.permute.xlu1 %55  ;;  %v54_v18 = vpop.permute.xlu0 %53 }
  0x85   :  { %v66_v21 = vadd.f32 %v56_v17, %v50_v15  ;;  %v65_v22 = vadd.f32 %v54_v18, %v49_v16 }
  0x87   :  { %v70_v25 = vmul.f32 0.25, %v66_v21  ;;  %v69_v26 = vmul.f32 0.25, %v65_v22 }
  0x88   :  { %v60_v27 = vpop.permute.xlu1 %59  ;;  %v58_v28 = vpop.permute.xlu0 %57 }
  0x89   :  { %v68_v29 = vadd.f32 %v60_v27, %v52_v23  ;;  %v67_v30 = vadd.f32 %v58_v28, %v51_v24  ;;  %v73_v31 = vpack.c.bf16 %v70_v25, %v69_v26 }
  0x8b   :  { %v72_v32 = vmul.f32 0.25, %v68_v29  ;;  %v71_v33 = vmul.f32 0.25, %v67_v30  ;;  %168 = vmatprep.mubr.msk.bf16.mxu0 %vm83_vm0, %v73_v31 }
  0x8d   :  { %v74_v34 = vpack.c.bf16 %v72_v32, %v71_v33 }
  0x8f   :  { %169 = vmatmul.mubr.msk.bf16.vlgmr.msra.gmra.mxu0 %vm83_vm0, %v74_v34 }
 0x14f   :  { %v170_v35 = vpop.f32.mrf.mxu0 }
 0x150   :  { %142 = vst.msk [vmem:[#allocation2 + $0x10] sm:$0xff] %vm139_vm1, %v170_v35 }
 0x151   :  { %v124_v36 = vpop.f32.mrf.mxu0 }
 0x152   :  { %140 = vst.msk [vmem:[#allocation2] sm:$0xff] %vm139_vm1, %v124_v36 }
 0x153   :  { %v171_v37 = vpop.f32.mrf.mxu0 }
 0x154   :  { %143 = vst.msk [vmem:[#allocation2 + $0x18] sm:$0xff] %vm139_vm1, %v171_v37 }
 0x155   :  { %v127_v38 = vpop.f32.mrf.mxu0 }
 0x156   :  { %141 = vst.msk [vmem:[#allocation2 + $0x8] sm:$0xff] %vm139_vm1, %v127_v38 }
 0x157   :  { %190 = shalt.err (!%p187_p4)
}
 0x158   :  { %s205_s23 = smov 128   ;;  %s206_s24 = smov 8  }
 0x159   :  { %155 = dma.vmem_to_hbm [thread:$0]  %s150_s1, 512, %s242_s2, [#allocation3], %s205_s23, %s205_s23, %s206_s24  }
 0x15a   :  { %199 = dma.done.wait [#allocation3], 512  }
 0x15b   :  { %200 = vsyncadd [#allocation3], 4294966784 }
 0x15c   :  { %159 = vsyncpa [#allocation3], 1 }

</bundles_post_ra>
